<compile_context>
chip_gen: v7x
topology: tpu7x:2x2x1
jax: 0.10.0
libtpu: 0.0.40
codegen_flags: <defaults>
</compile_context>

<pallas_src>
import functools
import inspect

import jax
import jax.numpy as jnp
from jax.experimental import pallas as pl
from jax.experimental.pallas import tpu as pltpu


def _round_up(n: int, m: int) -> int:
    return ((n + m - 1) // m) * m


# Single-buffer constant (weight/bias) blocks when the installed Pallas supports it.
if "pipeline_mode" in inspect.signature(pl.BlockSpec).parameters and hasattr(pl, "Buffered"):
    _RESIDENT = dict(pipeline_mode=pl.Buffered(1))
else:  # pragma: no cover - older Pallas: fall back to default double buffering
    _RESIDENT = {}


def _ffn_kernel(x_ref, wu_ref, bu_ref, wd_ref, bd_ref, o_ref):
    # x_ref:  (tm, Dp)  input rows (original dtype, f32 here)
    # wu_ref: (Dp, Fp)  up-projection weight, (in, out) layout, compute dtype
    # bu_ref: (1, Fp)   up-projection bias (f32)
    # wd_ref: (Fp, Dp)  down-projection weight, (in, out) layout, compute dtype
    # bd_ref: (1, Dp)   down-projection bias (f32)
    x = x_ref[...]
    # MXU passes in compute dtype, f32 accumulation via preferred_element_type.
    h = jnp.dot(x.astype(wu_ref.dtype), wu_ref[...],
                preferred_element_type=jnp.float32)
    h = jnp.maximum(h + bu_ref[...], 0.0)                     # bias + ReLU in f32 (VPU)
    y = jnp.dot(h.astype(wd_ref.dtype), wd_ref[...],
                preferred_element_type=jnp.float32)
    o_ref[...] = (y + bd_ref[...] + x.astype(jnp.float32)).astype(o_ref.dtype)


def residual_ffn(x, wu, bu, wd, bd, *, tm=256, compute_dtype=jnp.bfloat16):
    """Fused residual FFN.

    x:  (M, D)  activations (rows = batch*seq, features on the lane axis)
    wu: (D, F)  up-projection weight in (in, out) layout  (== torch W_up.weight.T)
    bu: (F,)    up-projection bias
    wd: (F, D)  down-projection weight in (in, out) layout (== torch W_down.weight.T)
    bd: (D,)    down-projection bias
    """
    M, D = x.shape
    F = wu.shape[1]
    assert wu.shape == (D, F) and wd.shape == (F, D)
    assert bu.shape == (F,) and bd.shape == (D,)

    # Lane-dense feature padding (multiples of 128) and a 128-aligned row tile.
    Dp = _round_up(D, 128)
    Fp = _round_up(F, 128)
    tm = max(128, _round_up(tm, 128))
    Mp = _round_up(M, 128)
    tm_eff = min(tm, Mp)
    Mp = _round_up(Mp, tm_eff)
    grid = (Mp // tm_eff,)

    # Zero padding is exact: padded x cols / weight rows+cols / biases are 0, relu(0)=0,
    # so padded output rows/cols are garbage-free zeros-or-sliced-off.
    x_p = jnp.pad(x, ((0, Mp - M), (0, Dp - D)))
    wu_p = jnp.pad(wu, ((0, Dp - D), (0, Fp - F))).astype(compute_dtype)
    wd_p = jnp.pad(wd, ((0, Fp - F), (0, Dp - D))).astype(compute_dtype)
    bu_p = jnp.pad(bu, (0, Fp - F)).reshape(1, Fp).astype(jnp.float32)
    bd_p = jnp.pad(bd, (0, Dp - D)).reshape(1, Dp).astype(jnp.float32)

    x_bytes = jnp.dtype(x.dtype).itemsize
    w_bytes = jnp.dtype(compute_dtype).itemsize

    # VMEM budget: single-buffered weights + double-buffered x/out tiles + f32 temporaries.
    est = (2 * Dp * Fp * w_bytes          # resident weights (1 buffer each)
           + 4 * (Fp + Dp)                # biases
           + 4 * tm_eff * Dp * x_bytes    # x + out tiles, double buffered
           + 4 * tm_eff * (Fp + Dp))      # f32 intermediates (h, y)
    vmem_limit = int(min(max(2 * est, 32 * 1024 * 1024), 128 * 1024 * 1024))

    cost = pl.CostEstimate(
        flops=4 * Mp * Dp * Fp,
        transcendentals=0,
        bytes_accessed=2 * Mp * Dp * x_bytes + 2 * Dp * Fp * w_bytes + 4 * (Fp + Dp),
    )

    out_p = pl.pallas_call(
        _ffn_kernel,
        out_shape=jax.ShapeDtypeStruct((Mp, Dp), x.dtype),
        grid_spec=pltpu.PrefetchScalarGridSpec(
            num_scalar_prefetch=0,
            grid=grid,
            in_specs=[
                pl.BlockSpec((tm_eff, Dp), lambda i: (i, 0)),             # x rows
                pl.BlockSpec((Dp, Fp), lambda i: (0, 0), **_RESIDENT),    # W_up (resident)
                pl.BlockSpec((1, Fp), lambda i: (0, 0), **_RESIDENT),     # b_up
                pl.BlockSpec((Fp, Dp), lambda i: (0, 0), **_RESIDENT),    # W_down (resident)
                pl.BlockSpec((1, Dp), lambda i: (0, 0), **_RESIDENT),     # b_down
            ],
            out_specs=pl.BlockSpec((tm_eff, Dp), lambda i: (i, 0)),
        ),
        compiler_params=pltpu.CompilerParams(
            dimension_semantics=("parallel",),   # rows shard across the 2 TCs on v7x
            vmem_limit_bytes=vmem_limit,
        ),
        cost_estimate=cost,
        input_output_aliases={0: 0},             # reuse the padded-x HBM buffer for output
    )(x_p, wu_p, bu_p, wd_p, bd_p)

    return out_p[:M, :D]


def residual_ffn_ref(x, wu, bu, wd, bd):
    h = jnp.maximum(x @ wu + bu, 0.0)
    return h @ wd + bd + x


if __name__ == "__main__":
    batch, seq = 2, 8
    residual_dim, feedforward_dim = 32, 64

    key = jax.random.PRNGKey(0)
    kx, k1, k2, k3, k4 = jax.random.split(key, 5)

    # PyTorch nn.Linear-style uniform init, weights in torch (out, in) layout.
    bound_up = 1.0 / float(jnp.sqrt(residual_dim))
    bound_dn = 1.0 / float(jnp.sqrt(feedforward_dim))
    w_up = jax.random.uniform(k1, (feedforward_dim, residual_dim), jnp.float32,
                              -bound_up, bound_up)
    b_up = jax.random.uniform(k2, (feedforward_dim,), jnp.float32, -bound_up, bound_up)
    w_down = jax.random.uniform(k3, (residual_dim, feedforward_dim), jnp.float32,
                                -bound_dn, bound_dn)
    b_down = jax.random.uniform(k4, (residual_dim,), jnp.float32, -bound_dn, bound_dn)

    # One-time parameter-load transpose to (in, out) layout (outside the per-call path).
    wu = jnp.asarray(w_up.T)     # (D, F)
    wd = jnp.asarray(w_down.T)   # (F, D)

    x = jax.random.normal(kx, (batch, seq, residual_dim), jnp.float32)
    x_flat = x.reshape(batch * seq, residual_dim)

    ffn_f32 = jax.jit(functools.partial(residual_ffn, compute_dtype=jnp.float32))
    ffn_bf16 = jax.jit(functools.partial(residual_ffn, compute_dtype=jnp.bfloat16))

    out_f32 = ffn_f32(x_flat, wu, b_up, wd, b_down)
    jax.block_until_ready(out_f32)
    out_bf16 = ffn_bf16(x_flat, wu, b_up, wd, b_down)
    jax.block_until_ready(out_bf16)

    ref = residual_ffn_ref(x_flat, wu, b_up, wd, b_down)

    assert out_f32.shape == (batch * seq, residual_dim)
    assert jnp.allclose(out_f32, ref, atol=1e-5, rtol=1e-5), "f32 kernel mismatch vs reference"
    assert jnp.allclose(out_bf16, ref, atol=5e-2, rtol=5e-2), "bf16 kernel mismatch vs reference"

    out = out_f32.reshape(batch, seq, residual_dim)
    jax.block_until_ready(out)
    print("KERNEL_OK")
</pallas_src>

<mosaic_0001>
module attributes {stable_mosaic.version = 11 : i64} {
  func.func @_ffn_kernel(%arg0: i32, %arg1: memref<128x128xf32, #tpu.memory_space<vmem>>, %arg2: memref<128x128xf32, #tpu.memory_space<vmem>>, %arg3: memref<1x128xf32, #tpu.memory_space<vmem>>, %arg4: memref<128x128xf32, #tpu.memory_space<vmem>>, %arg5: memref<1x128xf32, #tpu.memory_space<vmem>>, %arg6: memref<128x128xf32, #tpu.memory_space<vmem>>) attributes {dimension_semantics = [#tpu.dimension_semantics<parallel>], iteration_bounds = array<i64: 1>, scalar_prefetch = 0 : i64, scratch_operands = 0 : i64, tpu.core_type = #tpu.core_type<tc>, window_params = [{transform_indices = @transform_0, window_bounds = array<i64: 128, 128>}, {pipeline_mode = #tpu.pipeline_mode<synchronous>, transform_indices = @transform_1, window_bounds = array<i64: 128, 128>}, {pipeline_mode = #tpu.pipeline_mode<synchronous>, transform_indices = @transform_2, window_bounds = array<i64: 1, 128>}, {pipeline_mode = #tpu.pipeline_mode<synchronous>, transform_indices = @transform_3, window_bounds = array<i64: 128, 128>}, {pipeline_mode = #tpu.pipeline_mode<synchronous>, transform_indices = @transform_4, window_bounds = array<i64: 1, 128>}, {transform_indices = @transform_5, window_bounds = array<i64: 128, 128>}]} {
    %c0 = arith.constant 0 : index
    %c0_0 = arith.constant 0 : index
    %0 = vector.load %arg1[%c0, %c0_0] : memref<128x128xf32, #tpu.memory_space<vmem>>, vector<128x128xf32>
    %c0_1 = arith.constant 0 : index
    %c0_2 = arith.constant 0 : index
    %1 = vector.load %arg2[%c0_1, %c0_2] : memref<128x128xf32, #tpu.memory_space<vmem>>, vector<128x128xf32>
    %cst = arith.constant dense<0.000000e+00> : vector<128x128xf32>
    %2 = tpu.matmul %0, %1, %cst {dimension_numbers = #tpu.dot_dimension_numbers<[1], [0], [0], [1], [0, 0, 1, 1], [], []>} : vector<128x128xf32>, vector<128x128xf32>, vector<128x128xf32> -> vector<128x128xf32>
    %c0_3 = arith.constant 0 : index
    %c0_4 = arith.constant 0 : index
    %3 = vector.load %arg3[%c0_3, %c0_4] : memref<1x128xf32, #tpu.memory_space<vmem>>, vector<1x128xf32>
    %4 = vector.broadcast %3 : vector<1x128xf32> to vector<128x128xf32>
    %5 = arith.addf %2, %4 : vector<128x128xf32>
    %cst_5 = arith.constant 0.000000e+00 : f32
    %6 = vector.broadcast %cst_5 : f32 to vector<128x128xf32>
    %7 = arith.maximumf %5, %6 : vector<128x128xf32>
    %c0_6 = arith.constant 0 : index
    %c0_7 = arith.constant 0 : index
    %8 = vector.load %arg4[%c0_6, %c0_7] : memref<128x128xf32, #tpu.memory_space<vmem>>, vector<128x128xf32>
    %cst_8 = arith.constant dense<0.000000e+00> : vector<128x128xf32>
    %9 = tpu.matmul %7, %8, %cst_8 {dimension_numbers = #tpu.dot_dimension_numbers<[1], [0], [0], [1], [0, 0, 1, 1], [], []>} : vector<128x128xf32>, vector<128x128xf32>, vector<128x128xf32> -> vector<128x128xf32>
    %c0_9 = arith.constant 0 : index
    %c0_10 = arith.constant 0 : index
    %10 = vector.load %arg5[%c0_9, %c0_10] : memref<1x128xf32, #tpu.memory_space<vmem>>, vector<1x128xf32>
    %11 = vector.broadcast %10 : vector<1x128xf32> to vector<128x128xf32>
    %12 = arith.addf %9, %11 : vector<128x128xf32>
    %13 = arith.addf %12, %0 : vector<128x128xf32>
    %c0_11 = arith.constant 0 : index
    %c0_12 = arith.constant 0 : index
    %14 = vector.load %arg6[%c0_11, %c0_12] : memref<128x128xf32, #tpu.memory_space<vmem>>, vector<128x128xf32>
    tpu.vector_store %arg6[%c0_11, %c0_12], %13 {strides = array<i32>} : memref<128x128xf32, #tpu.memory_space<vmem>>, vector<128x128xf32>,
    return
  }
  func.func @transform_0(%arg0: i32) -> (i32, i32) {
    %c0_i32 = arith.constant 0 : i32
    %c0_i32_0 = arith.constant 0 : i32
    return %arg0, %c0_i32 : i32, i32
  }
  func.func @transform_1(%arg0: i32) -> (i32, i32) {
    %c0_i32 = arith.constant 0 : i32
    %c0_i32_0 = arith.constant 0 : i32
    %c0_i32_1 = arith.constant 0 : i32
    return %c0_i32, %c0_i32_0 : i32, i32
  }
  func.func @transform_2(%arg0: i32) -> (i32, i32) {
    %c0_i32 = arith.constant 0 : i32
    %c0_i32_0 = arith.constant 0 : i32
    %c0_i32_1 = arith.constant 0 : i32
    return %c0_i32, %c0_i32_0 : i32, i32
  }
  func.func @transform_3(%arg0: i32) -> (i32, i32) {
    %c0_i32 = arith.constant 0 : i32
    %c0_i32_0 = arith.constant 0 : i32
    %c0_i32_1 = arith.constant 0 : i32
    return %c0_i32, %c0_i32_0 : i32, i32
  }
  func.func @transform_4(%arg0: i32) -> (i32, i32) {
    %c0_i32 = arith.constant 0 : i32
    %c0_i32_0 = arith.constant 0 : i32
    %c0_i32_1 = arith.constant 0 : i32
    return %c0_i32, %c0_i32_0 : i32, i32
  }
  func.func @transform_5(%arg0: i32) -> (i32, i32) {
    %c0_i32 = arith.constant 0 : i32
    %c0_i32_0 = arith.constant 0 : i32
    return %arg0, %c0_i32 : i32, i32
  }
}

</mosaic_0001>

<bundles_post_ra>
// kernel: residual_ffn.1
= control target key start
LH: loop header
LB: loop body
LE: loop exit
PB: predicated region body
PF: predicated region fallthrough
CT: control target
= control target key end

     0   :  { %s958_s1 = inlined_call_operand.vmem [shape: f32[128,128], index: 1, kind: input, shape index: {}]   ;;  %s959_s0 = inlined_call_operand.vmem [shape: f32[128,128], index: 0, kind: input, shape index: {}, may-alias: {0,5}]   ;;  %s960_s3 = inlined_call_operand.vmem [shape: f32[128,128], index: 3, kind: input, shape index: {}]   ;;  %s961_s2 = inlined_call_operand.vmem [shape: f32[1,128], index: 2, kind: input, shape index: {}]   ;;  %s962_s4 = inlined_call_operand.vmem [shape: f32[1,128], index: 4, kind: input, shape index: {}]   ;;  %s963_s5 = inlined_call_operand.vmem [shape: f32[128,128], index: 5, kind: output, shape index: {}, may-alias: {0,5}]  }
   0x1   :  { %v36_v0 = vld [vmem:[%s958_s1] sm:$0xff]  ;;  %v37_v1 = vld [vmem:[%s958_s1 + $0x8] sm:$0xff]  ;;  %v38_v2 = vld [vmem:[%s958_s1 + $0x10] sm:$0xff] }
   0x2   :  { %v602_v3 = vpack.c.bf16 %v37_v1, %v36_v0  ;;  %v39_v4 = vld [vmem:[%s958_s1 + $0x18] sm:$0xff]  ;;  %v40_v6 = vld [vmem:[%s958_s1 + $0x20] sm:$0xff]  ;;  %v41_v7 = vld [vmem:[%s958_s1 + $0x28] sm:$0xff] }
   0x3   :  { %v606_v5 = vpack.c.bf16 %v39_v4, %v38_v2  ;;  %v610_v8 = vpack.c.bf16 %v41_v7, %v40_v6  ;;  %v717_v9 = vld [vmem:[%s959_s0] sm:$0xff]  ;;  %v42_v10 = vld [vmem:[%s958_s1 + $0x30] sm:$0xff]  ;;  %v43_v11 = vld [vmem:[%s958_s1 + $0x38] sm:$0xff] }
   0x4   :  { %603 = vmatprep.subr.bf16.mxu0 %v602_v3  ;;  %522 = vmatprep.mubr.f32.mxu0 %v717_v9  ;;  %v614_v12 = vpack.c.bf16 %v43_v11, %v42_v10  ;;  %v44_v13 = vld [vmem:[%s958_s1 + $0x40] sm:$0xff]  ;;  %v45_v14 = vld [vmem:[%s958_s1 + $0x48] sm:$0xff]  ;;  %v222_v17 = vld [vmem:[%s960_s3 + $0x10] sm:$0xff] }
   0x5   :  { %605 = vmatpush3.bf16.msra.mxu0 %v602_v3  ;;  %v220_v15 = vld [vmem:[%s960_s3] sm:$0xff]  ;;  %v221_v16 = vld [vmem:[%s960_s3 + $0x8] sm:$0xff]  ;;  %v223_v18 = vld [vmem:[%s960_s3 + $0x18] sm:$0xff]  ;;  %v618_v21 = vpack.c.bf16 %v45_v14, %v44_v13 }
   0x6   :  { %607 = vmatprep.subr.bf16.mxu0 %v606_v5  ;;  %v634_v19 = vpack.c.bf16 %v221_v16, %v220_v15  ;;  %v638_v20 = vpack.c.bf16 %v223_v18, %v222_v17  ;;  %v224_v22 = vld [vmem:[%s960_s3 + $0x20] sm:$0xff]  ;;  %v225_v23 = vld [vmem:[%s960_s3 + $0x28] sm:$0xff]  ;;  %v46_v24 = vld [vmem:[%s958_s1 + $0x50] sm:$0xff] }
   0x7   :  { %v47_v25 = vld [vmem:[%s958_s1 + $0x58] sm:$0xff]  ;;  %v642_v26 = vpack.c.bf16 %v225_v23, %v224_v22  ;;  %v226_v28 = vld [vmem:[%s960_s3 + $0x30] sm:$0xff]  ;;  %v48_v30 = vld [vmem:[%s958_s1 + $0x60] sm:$0xff] }
   0x8   :  { %635 = vmatprep.subr.bf16.mxu1 %v634_v19  ;;  %v622_v27 = vpack.c.bf16 %v47_v25, %v46_v24  ;;  %v227_v29 = vld [vmem:[%s960_s3 + $0x38] sm:$0xff]  ;;  %v49_v31 = vld [vmem:[%s958_s1 + $0x68] sm:$0xff]  ;;  %v228_v34 = vld [vmem:[%s960_s3 + $0x40] sm:$0xff] }
   0x9   :  { %609 = vmatpush3.bf16.msra.mxu0 %v606_v5  ;;  %637 = vmatpush3.bf16.msra.mxu1 %v634_v19  ;;  %v646_v32 = vpack.c.bf16 %v227_v29, %v226_v28  ;;  %v626_v33 = vpack.c.bf16 %v49_v31, %v48_v30  ;;  %v229_v35 = vld [vmem:[%s960_s3 + $0x48] sm:$0xff]  ;;  %v50_v36 = vld [vmem:[%s958_s1 + $0x70] sm:$0xff]  ;;  %v51_v37 = vld [vmem:[%s958_s1 + $0x78] sm:$0xff] }
   0xa   :  { %611 = vmatprep.subr.bf16.mxu0 %v610_v8  ;;  %639 = vmatprep.subr.bf16.mxu1 %v638_v20  ;;  %v650_v38 = vpack.c.bf16 %v229_v35, %v228_v34  ;;  %v630_v39 = vpack.c.bf16 %v51_v37, %v50_v36  ;;  %v230_v40 = vld [vmem:[%s960_s3 + $0x50] sm:$0xff]  ;;  %v231_v41 = vld [vmem:[%s960_s3 + $0x58] sm:$0xff]  ;;  %v232_v43 = vld [vmem:[%s960_s3 + $0x60] sm:$0xff] }
   0xb   :  { %v654_v42 = vpack.c.bf16 %v231_v41, %v230_v40  ;;  %v233_v44 = vld [vmem:[%s960_s3 + $0x68] sm:$0xff]  ;;  %v800_v47 = vld [vmem:[%s959_s0 + $0x10] sm:$0xff]  ;;  %v807_v48 = vld [vmem:[%s959_s0 + $0x18] sm:$0xff] }
   0xc   :  { %v795_v45 = vld [vmem:[%s959_s0 + $0x8] sm:$0xff]  ;;  %v658_v46 = vpack.c.bf16 %v233_v44, %v232_v43  ;;  %v812_v49 = vld [vmem:[%s959_s0 + $0x20] sm:$0xff]  ;;  %v824_v51 = vld [vmem:[%s959_s0 + $0x30] sm:$0xff] }
   0xd   :  { %613 = vmatpush3.bf16.msra.mxu0 %v610_v8  ;;  %641 = vmatpush3.bf16.msra.mxu1 %v638_v20  ;;  %v819_v50 = vld [vmem:[%s959_s0 + $0x28] sm:$0xff]  ;;  %v831_v52 = vld [vmem:[%s959_s0 + $0x38] sm:$0xff]  ;;  %v836_v53 = vld [vmem:[%s959_s0 + $0x40] sm:$0xff] }
   0xe   :  { %615 = vmatprep.subr.bf16.mxu0 %v614_v12  ;;  %643 = vmatprep.subr.bf16.mxu1 %v642_v26  ;;  %v843_v54 = vld [vmem:[%s959_s0 + $0x48] sm:$0xff]  ;;  %v848_v55 = vld [vmem:[%s959_s0 + $0x50] sm:$0xff]  ;;  %v855_v56 = vld [vmem:[%s959_s0 + $0x58] sm:$0xff] }
   0xf   :  { %v860_v57 = vld [vmem:[%s959_s0 + $0x60] sm:$0xff]  ;;  %v867_v58 = vld [vmem:[%s959_s0 + $0x68] sm:$0xff]  ;;  %v872_v59 = vld [vmem:[%s959_s0 + $0x70] sm:$0xff] }
  0x10   :  { %v879_v60 = vld [vmem:[%s959_s0 + $0x78] sm:$0xff]  ;;  %v234_v61 = vld [vmem:[%s960_s3 + $0x70] sm:$0xff]  ;;  %v424_v0 = vld [vmem:[%s961_s2] ss:$0 sm:$0xff] }
  0x11   :  { %617 = vmatpush3.bf16.msra.mxu0 %v614_v12  ;;  %645 = vmatpush3.bf16.msra.mxu1 %v642_v26  ;;  %v235_v62 = vld [vmem:[%s960_s3 + $0x78] sm:$0xff] }
  0x12   :  { %619 = vmatprep.subr.bf16.mxu0 %v618_v21  ;;  %647 = vmatprep.subr.bf16.mxu1 %v646_v32  ;;  %v662_v63 = vpack.c.bf16 %v235_v62, %v234_v61 }
  0x15   :  { %621 = vmatpush3.bf16.msra.mxu0 %v618_v21  ;;  %649 = vmatpush3.bf16.msra.mxu1 %v646_v32 }
  0x16   :  { %623 = vmatprep.subr.bf16.mxu0 %v622_v27  ;;  %651 = vmatprep.subr.bf16.mxu1 %v650_v38 }
  0x19   :  { %625 = vmatpush3.bf16.msra.mxu0 %v622_v27  ;;  %653 = vmatpush3.bf16.msra.mxu1 %v650_v38 }
  0x1a   :  { %627 = vmatprep.subr.bf16.mxu0 %v626_v33  ;;  %655 = vmatprep.subr.bf16.mxu1 %v654_v42 }
  0x1d   :  { %629 = vmatpush3.bf16.msra.mxu0 %v626_v33  ;;  %657 = vmatpush3.bf16.msra.mxu1 %v654_v42 }
  0x1e   :  { %631 = vmatprep.subr.bf16.mxu0 %v630_v39  ;;  %659 = vmatprep.subr.bf16.mxu1 %v658_v46 }
  0x21   :  { %633 = vmatpush3.bf16.msra.mxu0 %v630_v39  ;;  %661 = vmatpush3.bf16.msra.mxu1 %v658_v46 }
  0x22   :  { %663 = vmatprep.subr.bf16.mxu1 %v662_v63 }
  0x24   :  { %523 = vmatmul.mubr.f32.vlgmr.msra.gmra.mrb[0].mxu0 %v795_v45 }
  0x25   :  { %525 = vmatprep.mubr.f32.mxu0 %v800_v47  ;;  %665 = vmatpush3.bf16.msra.mxu1 %v662_v63 }
  0x28   :  { %526 = vmatmul.mubr.f32.gmra.mrb[2].mxu0 %v807_v48 }
  0x29   :  { %528 = vmatprep.mubr.f32.mxu0 %v812_v49 }
  0x2c   :  { %529 = vmatmul.mubr.f32.gmra.mrb[4].mxu0 %v819_v50 }
  0x2d   :  { %531 = vmatprep.mubr.f32.mxu0 %v824_v51 }
  0x30   :  { %532 = vmatmul.mubr.f32.gmra.mrb[6].mxu0 %v831_v52 }
  0x31   :  { %534 = vmatprep.mubr.f32.mxu0 %v836_v53 }
  0x34   :  { %535 = vmatmul.mubr.f32.gmra.mrb[8].mxu0 %v843_v54 }
  0x35   :  { %537 = vmatprep.mubr.f32.mxu0 %v848_v55 }
  0x38   :  { %538 = vmatmul.mubr.f32.gmra.mrb[10].mxu0 %v855_v56 }
  0x39   :  { %540 = vmatprep.mubr.f32.mxu0 %v860_v57 }
  0x3c   :  { %541 = vmatmul.mubr.f32.gmra.mrb[12].mxu0 %v867_v58 }
  0x3d   :  { %543 = vmatprep.mubr.f32.mxu0 %v872_v59 }
  0x40   :  { %544 = vmatmul.mubr.f32.gmra.mrb[14].mxu0 %v879_v60 }
  0xf7   :  { %v524_v1 = vpop.f32.mrb[0].mxu0 }
  0xf8   :  { %v131_v2 = vadd.f32 %v524_v1, %v424_v0  ;;  %v125_v3 = vpop.f32.mrb[1].mxu0 }
  0xf9   :  { %v126_v4 = vadd.f32 %v424_v0, %v125_v3 }
  0xfa   :  { %v205_v7 = vmax.f32 %v131_v2, 0.0  ;;  %v425_v2 = vld [vmem:[%s962_s4] ss:$0 sm:$0xff] }
  0xfb   :  { %v527_v5 = vpop.f32.mrb[2].mxu0  ;;  %v204_v6 = vmax.f32 %v126_v4, 0.0 }
  0xfc   :  { %v141_v8 = vadd.f32 %v527_v5, %v424_v0  ;;  %v135_v10 = vpop.f32.mrb[3].mxu0 }
  0xfd   :  { %v136_v11 = vadd.f32 %v424_v0, %v135_v10  ;;  %578 = vmatprep.mubr.f32.mxu1 %v204_v6 }
  0xfe   :  { %579 = vmatmul.mubr.f32.vlgmr.msra.gmra.mrb[0].mxu1 %v205_v7  ;;  %v207_v14 = vmax.f32 %v141_v8, 0.0 }
  0xff   :  { %v206_v12 = vmax.f32 %v136_v11, 0.0  ;;  %v530_v13 = vpop.f32.mrb[4].mxu0 }
 0x100   :  { %v151_v15 = vadd.f32 %v530_v13, %v424_v0  ;;  %v145_v16 = vpop.f32.mrb[5].mxu0 }
 0x101   :  { %v146_v17 = vadd.f32 %v424_v0, %v145_v16  ;;  %581 = vmatprep.mubr.f32.mxu1 %v206_v12 }
 0x102   :  { %582 = vmatmul.mubr.f32.gmra.mrb[2].mxu1 %v207_v14  ;;  %v209_v20 = vmax.f32 %v151_v15, 0.0 }
 0x103   :  { %v208_v18 = vmax.f32 %v146_v17, 0.0  ;;  %v533_v19 = vpop.f32.mrb[6].mxu0 }
 0x104   :  { %v161_v21 = vadd.f32 %v533_v19, %v424_v0  ;;  %v155_v22 = vpop.f32.mrb[7].mxu0 }
 0x105   :  { %v156_v23 = vadd.f32 %v424_v0, %v155_v22  ;;  %584 = vmatprep.mubr.f32.mxu1 %v208_v18 }
 0x106   :  { %585 = vmatmul.mubr.f32.gmra.mrb[4].mxu1 %v209_v20  ;;  %v211_v26 = vmax.f32 %v161_v21, 0.0 }
 0x107   :  { %v210_v24 = vmax.f32 %v156_v23, 0.0  ;;  %v536_v25 = vpop.f32.mrb[8].mxu0 }
 0x108   :  { %v171_v27 = vadd.f32 %v536_v25, %v424_v0  ;;  %v165_v28 = vpop.f32.mrb[9].mxu0 }
 0x109   :  { %v166_v29 = vadd.f32 %v424_v0, %v165_v28  ;;  %587 = vmatprep.mubr.f32.mxu1 %v210_v24 }
 0x10a   :  { %588 = vmatmul.mubr.f32.gmra.mrb[6].mxu1 %v211_v26  ;;  %v213_v32 = vmax.f32 %v171_v27, 0.0 }
 0x10b   :  { %v212_v30 = vmax.f32 %v166_v29, 0.0  ;;  %v539_v31 = vpop.f32.mrb[10].mxu0 }
 0x10c   :  { %v181_v33 = vadd.f32 %v539_v31, %v424_v0  ;;  %v175_v34 = vpop.f32.mrb[11].mxu0 }
 0x10d   :  { %v176_v35 = vadd.f32 %v424_v0, %v175_v34  ;;  %590 = vmatprep.mubr.f32.mxu1 %v212_v30 }
 0x10e   :  { %591 = vmatmul.mubr.f32.gmra.mrb[8].mxu1 %v213_v32  ;;  %v215_v38 = vmax.f32 %v181_v33, 0.0 }
 0x10f   :  { %v214_v36 = vmax.f32 %v176_v35, 0.0  ;;  %v542_v37 = vpop.f32.mrb[12].mxu0 }
 0x110   :  { %v191_v39 = vadd.f32 %v542_v37, %v424_v0  ;;  %v185_v40 = vpop.f32.mrb[13].mxu0 }
 0x111   :  { %v186_v41 = vadd.f32 %v424_v0, %v185_v40  ;;  %593 = vmatprep.mubr.f32.mxu1 %v214_v36 }
 0x112   :  { %594 = vmatmul.mubr.f32.gmra.mrb[10].mxu1 %v215_v38  ;;  %v217_v44 = vmax.f32 %v191_v39, 0.0 }
 0x113   :  { %v216_v42 = vmax.f32 %v186_v41, 0.0  ;;  %v545_v43 = vpop.f32.mrb[14].mxu0 }
 0x114   :  { %v201_v46 = vadd.f32 %v545_v43, %v424_v0  ;;  %v195_v61 = vpop.f32.mrb[15].mxu0 }
 0x115   :  { %v196_v62 = vadd.f32 %v424_v0, %v195_v61  ;;  %596 = vmatprep.mubr.f32.mxu1 %v216_v42 }
 0x116   :  { %597 = vmatmul.mubr.f32.gmra.mrb[12].mxu1 %v217_v44  ;;  %v219_v1 = vmax.f32 %v201_v46, 0.0 }
 0x117   :  { %v218_v63 = vmax.f32 %v196_v62, 0.0 }
 0x119   :  { %599 = vmatprep.mubr.f32.mxu1 %v218_v63 }
 0x11a   :  { %600 = vmatmul.mubr.f32.gmra.mrb[14].mxu1 %v219_v1 }
 0x1d1   :  { %v580_v3 = vpop.f32.mrb[0].mxu1 }
 0x1d2   :  { %v315_v4 = vadd.f32 %v580_v3, %v425_v2  ;;  %v309_v5 = vpop.f32.mrb[1].mxu1 }
 0x1d3   :  { %v310_v6 = vadd.f32 %v425_v2, %v309_v5 }
 0x1d4   :  { %v389_v7 = vadd.f32 %v315_v4, %v795_v45 }
 0x1d5   :  { %v388_v8 = vadd.f32 %v310_v6, %v717_v9  ;;  %v583_v10 = vpop.f32.mrb[2].mxu1 }
 0x1d6   :  { %405 = vst [vmem:[%s963_s5 + $0x8] sm:$0xff] %v389_v7  ;;  %v325_v0 = vadd.f32 %v583_v10, %v425_v2  ;;  %v319_v11 = vpop.f32.mrb[3].mxu1 }
 0x1d7   :  { %404 = vst [vmem:[%s963_s5] sm:$0xff] %v388_v8  ;;  %v320_v12 = vadd.f32 %v425_v2, %v319_v11 }
 0x1d8   :  { %v391_v13 = vadd.f32 %v325_v0, %v807_v48 }
 0x1d9   :  { %v390_v14 = vadd.f32 %v320_v12, %v800_v47  ;;  %v586_v15 = vpop.f32.mrb[4].mxu1 }
 0x1da   :  { %407 = vst [vmem:[%s963_s5 + $0x18] sm:$0xff] %v391_v13  ;;  %v335_v9 = vadd.f32 %v586_v15, %v425_v2  ;;  %v329_v45 = vpop.f32.mrb[5].mxu1 }
 0x1db   :  { %406 = vst [vmem:[%s963_s5 + $0x10] sm:$0xff] %v390_v14  ;;  %v330_v16 = vadd.f32 %v425_v2, %v329_v45 }
 0x1dc   :  { %v393_v17 = vadd.f32 %v335_v9, %v819_v50 }
 0x1dd   :  { %v392_v18 = vadd.f32 %v330_v16, %v812_v49  ;;  %v589_v19 = vpop.f32.mrb[6].mxu1 }
 0x1de   :  { %409 = vst [vmem:[%s963_s5 + $0x28] sm:$0xff] %v393_v17  ;;  %v345_v47 = vadd.f32 %v589_v19, %v425_v2  ;;  %v339_v48 = vpop.f32.mrb[7].mxu1 }
 0x1df   :  { %408 = vst [vmem:[%s963_s5 + $0x20] sm:$0xff] %v392_v18  ;;  %v340_v20 = vadd.f32 %v425_v2, %v339_v48 }
 0x1e0   :  { %v395_v21 = vadd.f32 %v345_v47, %v831_v52 }
 0x1e1   :  { %v394_v22 = vadd.f32 %v340_v20, %v824_v51  ;;  %v592_v23 = vpop.f32.mrb[8].mxu1 }
 0x1e2   :  { %411 = vst [vmem:[%s963_s5 + $0x38] sm:$0xff] %v395_v21  ;;  %v355_v49 = vadd.f32 %v592_v23, %v425_v2  ;;  %v349_v50 = vpop.f32.mrb[9].mxu1 }
 0x1e3   :  { %410 = vst [vmem:[%s963_s5 + $0x30] sm:$0xff] %v394_v22  ;;  %v350_v24 = vadd.f32 %v425_v2, %v349_v50 }
 0x1e4   :  { %v397_v25 = vadd.f32 %v355_v49, %v843_v54 }
 0x1e5   :  { %v396_v26 = vadd.f32 %v350_v24, %v836_v53  ;;  %v595_v27 = vpop.f32.mrb[10].mxu1 }
 0x1e6   :  { %413 = vst [vmem:[%s963_s5 + $0x48] sm:$0xff] %v397_v25  ;;  %v365_v51 = vadd.f32 %v595_v27, %v425_v2  ;;  %v359_v52 = vpop.f32.mrb[11].mxu1 }
 0x1e7   :  { %412 = vst [vmem:[%s963_s5 + $0x40] sm:$0xff] %v396_v26  ;;  %v360_v28 = vadd.f32 %v425_v2, %v359_v52 }
 0x1e8   :  { %v399_v29 = vadd.f32 %v365_v51, %v855_v56 }
 0x1e9   :  { %v398_v30 = vadd.f32 %v360_v28, %v848_v55  ;;  %v598_v31 = vpop.f32.mrb[12].mxu1 }
 0x1ea   :  { %415 = vst [vmem:[%s963_s5 + $0x58] sm:$0xff] %v399_v29  ;;  %v375_v53 = vadd.f32 %v598_v31, %v425_v2  ;;  %v369_v54 = vpop.f32.mrb[13].mxu1 }
 0x1eb   :  { %414 = vst [vmem:[%s963_s5 + $0x50] sm:$0xff] %v398_v30  ;;  %v370_v32 = vadd.f32 %v425_v2, %v369_v54 }
 0x1ec   :  { %v401_v33 = vadd.f32 %v375_v53, %v867_v58 }
 0x1ed   :  { %v400_v34 = vadd.f32 %v370_v32, %v860_v57  ;;  %v601_v35 = vpop.f32.mrb[14].mxu1 }
 0x1ee   :  { %417 = vst [vmem:[%s963_s5 + $0x68] sm:$0xff] %v401_v33  ;;  %v385_v55 = vadd.f32 %v601_v35, %v425_v2  ;;  %v379_v56 = vpop.f32.mrb[15].mxu1 }
 0x1ef   :  { %416 = vst [vmem:[%s963_s5 + $0x60] sm:$0xff] %v400_v34  ;;  %v380_v36 = vadd.f32 %v425_v2, %v379_v56 }
 0x1f0   :  { %v403_v37 = vadd.f32 %v385_v55, %v879_v60 }
 0x1f1   :  { %v402_v38 = vadd.f32 %v380_v36, %v872_v59 }
 0x1f2   :  { %419 = vst [vmem:[%s963_s5 + $0x78] sm:$0xff] %v403_v37 }
 0x1f3   :  { %418 = vst [vmem:[%s963_s5 + $0x70] sm:$0xff] %v402_v38 }

</bundles_post_ra>
